<compile_context>
chip_gen: v7x
topology: tpu7x:2x2x1
jax: 0.10.0
libtpu: 0.0.40
codegen_flags: <defaults>
</compile_context>

<pallas_src>
import functools
import math

import jax
import jax.numpy as jnp
from jax.experimental import pallas as pl
from jax.experimental.pallas import tpu as pltpu


def _round_up(x, m):
    return ((x + m - 1) // m) * m


def bf_autoencoder_kernel(
    x_ref,        # (tB, 2A)   [hr | hi]               (matmul dtype)
    wblk_ref,     # (2A, 2P)   block-complex normalized PhaseShifter weight
    *refs,        # [seed?], w1s, b1, w2, b2, w3, b3, v_out
    A, P, inv_sqrt_antenna, has_noise, noise_scale):
    if has_noise:
        seed_ref, w1_ref, b1_ref, w2_ref, b2_ref, w3_ref, b3_ref, v_ref = refs
    else:
        w1_ref, b1_ref, w2_ref, b2_ref, w3_ref, b3_ref, v_ref = refs

    def mm(a, w_ref):
        # Weights are pre-cast wrapper-side; only the activation is cast here
        # (no-op when matmul_dtype == f32).  f32 accumulation on the MXU.
        return jnp.dot(a.astype(w_ref.dtype), w_ref[...],
                       preferred_element_type=jnp.float32)

    # --- fused block-complex beamforming matmul: one MXU push --------------
    bf = mm(x_ref[...], wblk_ref)                       # (tB, 2P) = [br | bi]

    if has_noise:
        # On-chip AWGN: same distribution as torch.normal(0,1)*sqrt(np/2)/nf.
        # TODO(synk): RNG stream differs from torch.normal (distribution-equivalent).
        pltpu.prng_seed(seed_ref[0] + pl.program_id(0))
        bf = bf + noise_scale * pltpu.stateful_normal(bf.shape, jnp.float32)

    # --- squared signal; w1s = [w1; w1] so  s @ w1s == (br^2 + bi^2) @ w1 --
    s = bf * bf                                          # (tB, 2P), f32

    # --- Beam_Synthesizer MLP (hidden dim zero-padded to 128 lanes) --------
    o = jnp.maximum(mm(s, w1_ref) + b1_ref[...], 0.0)
    o = jnp.maximum(mm(o, w2_ref) + b2_ref[...], 0.0)
    v = mm(o, w3_ref) + b3_ref[...]                      # (tB, 2A) = [vr | vi]

    # --- unit-modulus constraint: v / |v| / sqrt(num_antenna) (rsqrt on EUP)
    vr = v[:, :A]
    vi = v[:, A:]
    inv = jax.lax.rsqrt(vr * vr + vi * vi) * inv_sqrt_antenna   # (tB, A), f32
    v_ref[...] = v * jnp.concatenate([inv, inv], axis=1)


def init_params(key, num_antenna, num_probing_beam):
    """Deterministic kaiming_uniform-style init matching the torch shapes.
    Linear weights are generated pre-transposed to (in, out)."""
    A, P = num_antenna, num_probing_beam
    H = A * 5
    keys = jax.random.split(key, 8)

    def ku(k, shape, fan_in):
        bound = 1.0 / math.sqrt(fan_in)
        return jax.random.uniform(k, shape, jnp.float32, -bound, bound)

    return dict(
        W_real=ku(keys[0], (A, P), P),       # PhaseShifter.W_real
        W_imag=ku(keys[1], (A, P), P),       # PhaseShifter.W_imag
        w1=ku(keys[2], (P, H), P),           # dense1 (in, out)
        b1=ku(keys[3], (1, H), P),
        w2=ku(keys[4], (H, H), H),           # dense2
        b2=ku(keys[5], (1, H), H),
        w3=ku(keys[6], (H, 2 * A), H),       # dense3 kept fused (H, 2A)
        b3=ku(keys[7], (1, 2 * A), H),
    )


def bf_autoencoder_forward(h, params, noise_power=0.0, norm_factor=1.0,
                           noise_seed=0, matmul_dtype=jnp.bfloat16):
    """h: complex64 (B, 1, A), as consumed by the torch module (squeeze(dim=1)).
    Returns complex64 (B, A) beamformer v with |v| = 1/sqrt(num_antenna)."""
    B = h.shape[0]
    A, P = params['W_real'].shape
    H = params['w1'].shape[1]
    Hp = _round_up(H, 128)                   # lane-dense hidden dim
    inv_sqrt_A = 1.0 / math.sqrt(A)

    # --- hoisted PhaseShifter.get_W(): batch-independent, done once --------
    wr, wi = params['W_real'], params['W_imag']
    winv = jax.lax.rsqrt(wr * wr + wi * wi) * inv_sqrt_A
    wnr, wni = wr * winv, wi * winv
    wblk = jnp.concatenate(
        [jnp.concatenate([wnr, wni], axis=1),
         jnp.concatenate([-wni, wnr], axis=1)], axis=0)          # (2A, 2P)

    # --- zero-pad MLP hidden dim to 128 lanes; stack w1 so the kernel can
    #     consume [br^2 | bi^2] directly (no br/bi lane slices in-kernel) ----
    padH = Hp - H
    w1 = jnp.pad(params['w1'], ((0, 0), (0, padH)))
    w1s = jnp.concatenate([w1, w1], axis=0)                      # (2P, Hp)
    b1 = jnp.pad(params['b1'], ((0, 0), (0, padH)))
    w2 = jnp.pad(params['w2'], ((0, padH), (0, padH)))
    b2 = jnp.pad(params['b2'], ((0, 0), (0, padH)))
    w3 = jnp.pad(params['w3'], ((0, padH), (0, 0)))
    b3 = params['b3']

    # --- pack channel; pre-cast matmul operands wrapper-side ----------------
    hr = jnp.real(h).reshape(B, A).astype(jnp.float32)
    hi = jnp.imag(h).reshape(B, A).astype(jnp.float32)
    x = jnp.concatenate([hr, hi], axis=1).astype(matmul_dtype)   # (B, 2A)
    wblk = wblk.astype(matmul_dtype)
    w1s = w1s.astype(matmul_dtype)
    w2 = w2.astype(matmul_dtype)
    w3 = w3.astype(matmul_dtype)
    # biases stay f32 (added to the f32 MXU accumulators)

    # --- batch tiling: big tiles (per-step overhead ~0.35us) but >=2 grid
    #     steps when possible so v7x's 2nd TensorCore is used ---------------
    TILE_CAP = 1024
    Bp8 = _round_up(B, 8)
    if Bp8 <= 8:
        tile_B = Bp8
    elif Bp8 <= 2 * TILE_CAP:
        tile_B = _round_up(pl.cdiv(Bp8, 2), 8)
    else:
        tile_B = TILE_CAP
    Bp = _round_up(B, tile_B)
    # Padded batch rows yield v = b3 (bias only); they are sliced off below,
    # so they are never observed by the caller.
    x = jnp.pad(x, ((0, Bp - B), (0, 0)))

    has_noise = float(noise_power) != 0.0
    noise_scale = float(math.sqrt(float(noise_power) / 2.0) / float(norm_factor))

    inputs = [x, wblk]
    in_specs = [pl.BlockSpec((tile_B, 2 * A), lambda i: (i, 0)),
                pl.BlockSpec((2 * A, 2 * P), lambda i: (0, 0))]
    if has_noise:
        inputs.append(jnp.asarray([noise_seed], jnp.int32))
        in_specs.append(pl.BlockSpec(memory_space=pltpu.MemorySpace.SMEM))

    inputs += [w1s, b1, w2, b2, w3, b3]
    in_specs += [
        pl.BlockSpec((2 * P, Hp), lambda i: (0, 0)),
        pl.BlockSpec((1, Hp), lambda i: (0, 0)),
        pl.BlockSpec((Hp, Hp), lambda i: (0, 0)),
        pl.BlockSpec((1, Hp), lambda i: (0, 0)),
        pl.BlockSpec((Hp, 2 * A), lambda i: (0, 0)),
        pl.BlockSpec((1, 2 * A), lambda i: (0, 0)),
    ]

    kernel = functools.partial(
        bf_autoencoder_kernel, A=A, P=P, inv_sqrt_antenna=inv_sqrt_A,
        has_noise=has_noise, noise_scale=noise_scale)

    itemsize = jnp.dtype(matmul_dtype).itemsize
    weight_elems = 2 * A * 2 * P + 2 * P * Hp + Hp * Hp + Hp * 2 * A
    cost = pl.CostEstimate(
        flops=2 * Bp * weight_elems,
        transcendentals=Bp * A,                       # rsqrt per antenna
        bytes_accessed=(Bp * 2 * A * itemsize         # x in
                        + Bp * 2 * A * 4              # v out
                        + weight_elems * itemsize     # weights
                        + (2 * Hp + 2 * A) * 4))      # biases

    v_out = pl.pallas_call(
        kernel,
        out_shape=jax.ShapeDtypeStruct((Bp, 2 * A), jnp.float32),
        grid=(Bp // tile_B,),
        in_specs=in_specs,
        out_specs=pl.BlockSpec((tile_B, 2 * A), lambda i: (i, 0)),
        compiler_params=pltpu.CompilerParams(
            dimension_semantics=("parallel",)),
        cost_estimate=cost,
    )(*inputs)

    v_out = v_out[:B]
    return jax.lax.complex(v_out[:, :A], v_out[:, A:])            # (B, A)


def reference_forward(h, params):
    """Pure-JAX reference of the torch forward (noise_power = 0)."""
    A, P = params['W_real'].shape
    B = h.shape[0]
    hr = jnp.real(h).reshape(B, A).astype(jnp.float32)
    hi = jnp.imag(h).reshape(B, A).astype(jnp.float32)
    inv_sqrt_A = 1.0 / math.sqrt(A)
    wr, wi = params['W_real'], params['W_imag']
    wmag = jnp.sqrt(wr * wr + wi * wi)
    wnr = wr / wmag * inv_sqrt_A
    wni = wi / wmag * inv_sqrt_A
    br = hr @ wnr - hi @ wni
    bi = hr @ wni + hi @ wnr
    power = br * br + bi * bi
    o = jax.nn.relu(power @ params['w1'] + params['b1'])
    o = jax.nn.relu(o @ params['w2'] + params['b2'])
    v = o @ params['w3'] + params['b3']
    vr, vi = v[:, :A], v[:, A:]
    mag = jnp.sqrt(vr * vr + vi * vi)
    return jax.lax.complex(vr / mag * inv_sqrt_A, vi / mag * inv_sqrt_A)


if __name__ == "__main__":
    NUM_ANTENNA = 16
    NUM_PROBING_BEAM = 8
    BATCH = 4

    # deterministic example channel h: complex64, shape (B, 1, num_antenna)
    key = jax.random.PRNGKey(0)
    kh1, kh2 = jax.random.split(key)
    h = jax.lax.complex(
        jax.random.normal(kh1, (BATCH, 1, NUM_ANTENNA), jnp.float32),
        jax.random.normal(kh2, (BATCH, 1, NUM_ANTENNA), jnp.float32))

    params = init_params(jax.random.PRNGKey(42), NUM_ANTENNA, NUM_PROBING_BEAM)
    v_ref = reference_forward(h, params)

    # --- strict path: f32 matmul operands (matches the torch f32 forward) ---
    v32 = jax.block_until_ready(
        bf_autoencoder_forward(h, params, matmul_dtype=jnp.float32))
    assert v32.shape == (BATCH, NUM_ANTENNA)
    assert v32.dtype == jnp.complex64
    assert bool(jnp.allclose(jnp.abs(v32), 1.0 / math.sqrt(NUM_ANTENNA),
                             atol=1e-4))
    assert bool(jnp.allclose(v32, v_ref, atol=2e-2, rtol=2e-2))

    # --- default fast path: bf16 MXU operands, f32 accumulate/elementwise ---
    v = jax.block_until_ready(bf_autoencoder_forward(h, params))
    assert v.shape == (BATCH, NUM_ANTENNA)
    assert v.dtype == jnp.complex64
    # unit-modulus is enforced in f32 regardless of matmul dtype
    assert bool(jnp.allclose(jnp.abs(v), 1.0 / math.sqrt(NUM_ANTENNA),
                             atol=1e-4))
    # bf16 matmul operands: robust (median) closeness check vs f32 reference
    assert bool(jnp.median(jnp.abs(v - v_ref)) < 3e-2)

    print("KERNEL_OK")
</pallas_src>

<mosaic_0001>
module attributes {stable_mosaic.version = 11 : i64} {
  func.func @bf_autoencoder_kernel(%arg0: i32, %arg1: memref<8x32xf32, #tpu.memory_space<vmem>>, %arg2: memref<32x16xf32, #tpu.memory_space<vmem>>, %arg3: memref<16x128xf32, #tpu.memory_space<vmem>>, %arg4: memref<1x128xf32, #tpu.memory_space<vmem>>, %arg5: memref<128x128xf32, #tpu.memory_space<vmem>>, %arg6: memref<1x128xf32, #tpu.memory_space<vmem>>, %arg7: memref<128x32xf32, #tpu.memory_space<vmem>>, %arg8: memref<1x32xf32, #tpu.memory_space<vmem>>, %arg9: memref<8x32xf32, #tpu.memory_space<vmem>>) attributes {dimension_semantics = [#tpu.dimension_semantics<parallel>], iteration_bounds = array<i64: 1>, scalar_prefetch = 0 : i64, scratch_operands = 0 : i64, tpu.core_type = #tpu.core_type<tc>, window_params = [{transform_indices = @transform_0, window_bounds = array<i64: 8, 32>}, {pipeline_mode = #tpu.pipeline_mode<synchronous>, transform_indices = @transform_1, window_bounds = array<i64: 32, 16>}, {pipeline_mode = #tpu.pipeline_mode<synchronous>, transform_indices = @transform_2, window_bounds = array<i64: 16, 128>}, {pipeline_mode = #tpu.pipeline_mode<synchronous>, transform_indices = @transform_3, window_bounds = array<i64: 1, 128>}, {pipeline_mode = #tpu.pipeline_mode<synchronous>, transform_indices = @transform_4, window_bounds = array<i64: 128, 128>}, {pipeline_mode = #tpu.pipeline_mode<synchronous>, transform_indices = @transform_5, window_bounds = array<i64: 1, 128>}, {pipeline_mode = #tpu.pipeline_mode<synchronous>, transform_indices = @transform_6, window_bounds = array<i64: 128, 32>}, {pipeline_mode = #tpu.pipeline_mode<synchronous>, transform_indices = @transform_7, window_bounds = array<i64: 1, 32>}, {transform_indices = @transform_8, window_bounds = array<i64: 8, 32>}]} {
    %c0 = arith.constant 0 : index
    %c0_0 = arith.constant 0 : index
    %0 = vector.load %arg1[%c0, %c0_0] : memref<8x32xf32, #tpu.memory_space<vmem>>, vector<8x32xf32>
    %c0_1 = arith.constant 0 : index
    %c0_2 = arith.constant 0 : index
    %1 = vector.load %arg2[%c0_1, %c0_2] : memref<32x16xf32, #tpu.memory_space<vmem>>, vector<32x16xf32>
    %cst = arith.constant dense<0.000000e+00> : vector<8x16xf32>
    %2 = tpu.matmul %0, %1, %cst {dimension_numbers = #tpu.dot_dimension_numbers<[1], [0], [0], [1], [0, 0, 1, 1], [], []>} : vector<8x32xf32>, vector<32x16xf32>, vector<8x16xf32> -> vector<8x16xf32>
    %3 = arith.mulf %2, %2 : vector<8x16xf32>
    %c0_3 = arith.constant 0 : index
    %c0_4 = arith.constant 0 : index
    %4 = vector.load %arg3[%c0_3, %c0_4] : memref<16x128xf32, #tpu.memory_space<vmem>>, vector<16x128xf32>
    %cst_5 = arith.constant dense<0.000000e+00> : vector<8x128xf32>
    %5 = tpu.matmul %3, %4, %cst_5 {dimension_numbers = #tpu.dot_dimension_numbers<[1], [0], [0], [1], [0, 0, 1, 1], [], []>} : vector<8x16xf32>, vector<16x128xf32>, vector<8x128xf32> -> vector<8x128xf32>
    %c0_6 = arith.constant 0 : index
    %c0_7 = arith.constant 0 : index
    %6 = vector.load %arg4[%c0_6, %c0_7] : memref<1x128xf32, #tpu.memory_space<vmem>>, vector<1x128xf32>
    %7 = vector.broadcast %6 : vector<1x128xf32> to vector<8x128xf32>
    %8 = arith.addf %5, %7 : vector<8x128xf32>
    %cst_8 = arith.constant 0.000000e+00 : f32
    %9 = vector.broadcast %cst_8 : f32 to vector<8x128xf32>
    %10 = arith.maximumf %8, %9 : vector<8x128xf32>
    %c0_9 = arith.constant 0 : index
    %c0_10 = arith.constant 0 : index
    %11 = vector.load %arg5[%c0_9, %c0_10] : memref<128x128xf32, #tpu.memory_space<vmem>>, vector<128x128xf32>
    %cst_11 = arith.constant dense<0.000000e+00> : vector<8x128xf32>
    %12 = tpu.matmul %10, %11, %cst_11 {dimension_numbers = #tpu.dot_dimension_numbers<[1], [0], [0], [1], [0, 0, 1, 1], [], []>} : vector<8x128xf32>, vector<128x128xf32>, vector<8x128xf32> -> vector<8x128xf32>
    %c0_12 = arith.constant 0 : index
    %c0_13 = arith.constant 0 : index
    %13 = vector.load %arg6[%c0_12, %c0_13] : memref<1x128xf32, #tpu.memory_space<vmem>>, vector<1x128xf32>
    %14 = vector.broadcast %13 : vector<1x128xf32> to vector<8x128xf32>
    %15 = arith.addf %12, %14 : vector<8x128xf32>
    %cst_14 = arith.constant 0.000000e+00 : f32
    %16 = vector.broadcast %cst_14 : f32 to vector<8x128xf32>
    %17 = arith.maximumf %15, %16 : vector<8x128xf32>
    %c0_15 = arith.constant 0 : index
    %c0_16 = arith.constant 0 : index
    %18 = vector.load %arg7[%c0_15, %c0_16] : memref<128x32xf32, #tpu.memory_space<vmem>>, vector<128x32xf32>
    %cst_17 = arith.constant dense<0.000000e+00> : vector<8x32xf32>
    %19 = tpu.matmul %17, %18, %cst_17 {dimension_numbers = #tpu.dot_dimension_numbers<[1], [0], [0], [1], [0, 0, 1, 1], [], []>} : vector<8x128xf32>, vector<128x32xf32>, vector<8x32xf32> -> vector<8x32xf32>
    %c0_18 = arith.constant 0 : index
    %c0_19 = arith.constant 0 : index
    %20 = vector.load %arg8[%c0_18, %c0_19] : memref<1x32xf32, #tpu.memory_space<vmem>>, vector<1x32xf32>
    %21 = vector.broadcast %20 : vector<1x32xf32> to vector<8x32xf32>
    %22 = arith.addf %19, %21 : vector<8x32xf32>
    %23 = vector.extract_strided_slice %22 {offsets = [0, 0], sizes = [8, 16], strides = [1, 1]} : vector<8x32xf32> to vector<8x16xf32>
    %24 = vector.extract_strided_slice %22 {offsets = [0, 16], sizes = [8, 16], strides = [1, 1]} : vector<8x32xf32> to vector<8x16xf32>
    %25 = arith.mulf %23, %23 : vector<8x16xf32>
    %26 = arith.mulf %24, %24 : vector<8x16xf32>
    %27 = arith.addf %25, %26 : vector<8x16xf32>
    %28 = math.rsqrt %27 : vector<8x16xf32>
    %cst_20 = arith.constant 2.500000e-01 : f32
    %29 = vector.broadcast %cst_20 : f32 to vector<8x16xf32>
    %30 = arith.mulf %28, %29 : vector<8x16xf32>
    %31 = tpu.concatenate %30, %30 in 1 : vector<8x16xf32>, vector<8x16xf32> -> vector<8x32xf32>
    %32 = arith.mulf %22, %31 : vector<8x32xf32>
    %c0_21 = arith.constant 0 : index
    %c0_22 = arith.constant 0 : index
    %33 = vector.load %arg9[%c0_21, %c0_22] : memref<8x32xf32, #tpu.memory_space<vmem>>, vector<8x32xf32>
    tpu.vector_store %arg9[%c0_21, %c0_22], %32 {strides = array<i32>} : memref<8x32xf32, #tpu.memory_space<vmem>>, vector<8x32xf32>,
    return
  }
  func.func @transform_0(%arg0: i32) -> (i32, i32) {
    %c0_i32 = arith.constant 0 : i32
    %c0_i32_0 = arith.constant 0 : i32
    return %arg0, %c0_i32 : i32, i32
  }
  func.func @transform_1(%arg0: i32) -> (i32, i32) {
    %c0_i32 = arith.constant 0 : i32
    %c0_i32_0 = arith.constant 0 : i32
    %c0_i32_1 = arith.constant 0 : i32
    return %c0_i32, %c0_i32_0 : i32, i32
  }
  func.func @transform_2(%arg0: i32) -> (i32, i32) {
    %c0_i32 = arith.constant 0 : i32
    %c0_i32_0 = arith.constant 0 : i32
    %c0_i32_1 = arith.constant 0 : i32
    return %c0_i32, %c0_i32_0 : i32, i32
  }
  func.func @transform_3(%arg0: i32) -> (i32, i32) {
    %c0_i32 = arith.constant 0 : i32
    %c0_i32_0 = arith.constant 0 : i32
    %c0_i32_1 = arith.constant 0 : i32
    return %c0_i32, %c0_i32_0 : i32, i32
  }
  func.func @transform_4(%arg0: i32) -> (i32, i32) {
    %c0_i32 = arith.constant 0 : i32
    %c0_i32_0 = arith.constant 0 : i32
    %c0_i32_1 = arith.constant 0 : i32
    return %c0_i32, %c0_i32_0 : i32, i32
  }
  func.func @transform_5(%arg0: i32) -> (i32, i32) {
    %c0_i32 = arith.constant 0 : i32
    %c0_i32_0 = arith.constant 0 : i32
    %c0_i32_1 = arith.constant 0 : i32
    return %c0_i32, %c0_i32_0 : i32, i32
  }
  func.func @transform_6(%arg0: i32) -> (i32, i32) {
    %c0_i32 = arith.constant 0 : i32
    %c0_i32_0 = arith.constant 0 : i32
    %c0_i32_1 = arith.constant 0 : i32
    return %c0_i32, %c0_i32_0 : i32, i32
  }
  func.func @transform_7(%arg0: i32) -> (i32, i32) {
    %c0_i32 = arith.constant 0 : i32
    %c0_i32_0 = arith.constant 0 : i32
    %c0_i32_1 = arith.constant 0 : i32
    return %c0_i32, %c0_i32_0 : i32, i32
  }
  func.func @transform_8(%arg0: i32) -> (i32, i32) {
    %c0_i32 = arith.constant 0 : i32
    %c0_i32_0 = arith.constant 0 : i32
    return %arg0, %c0_i32 : i32, i32
  }
}

</mosaic_0001>

<bundles_post_ra>
// kernel: tpu_custom_call.1
= control target key start
LH: loop header
LB: loop body
LE: loop exit
PB: predicated region body
PF: predicated region fallthrough
CT: control target
= control target key end

     0   :  { %v634_v3 = vmov 0.0|0.0   ;;  %vm635_vm0 = vmmov 0   ;;  %v636_v6 = vmov 0.0   ;;  %s850_s0 = inlined_call_operand.vmem [shape: f32[8,32], index: 0, kind: input, shape index: {}]   ;;  %s851_s1 = inlined_call_operand.vmem [shape: f32[32,16], index: 1, kind: input, shape index: {}]   ;;  %s852_s2 = inlined_call_operand.vmem [shape: f32[16,128], index: 2, kind: input, shape index: {}]   ;;  %s853_s3 = inlined_call_operand.vmem [shape: f32[1,128], index: 3, kind: input, shape index: {}]   ;;  %s854_s4 = inlined_call_operand.vmem [shape: f32[128,128], index: 4, kind: input, shape index: {}]   ;;  %s855_s5 = inlined_call_operand.vmem [shape: f32[1,128], index: 5, kind: input, shape index: {}]   ;;  %s856_s6 = inlined_call_operand.vmem [shape: f32[128,32], index: 6, kind: input, shape index: {}]   ;;  %s857_s7 = inlined_call_operand.vmem [shape: f32[1,32], index: 7, kind: input, shape index: {}]   ;;  %s858_s8 = inlined_call_operand.hbm [shape: f32[8,32], index: 8, kind: output, shape index: {}]  }
   0x1   :  { %v31_v0 = vld [vmem:[%s851_s1] sm:$0xff]  ;;  %v32_v1 = vld [vmem:[%s851_s1 + $0x8] sm:$0xff]  ;;  %v33_v2 = vld [vmem:[%s851_s1 + $0x10] sm:$0xff]  ;;  %545 = vmatprep.subr.bf16.mxu0 %v634_v3  ;;  %465 = vmatprep.mubr.msk.f32.mxu0 %vm635_vm0, %v636_v6 }
   0x2   :  { %v546_v4 = vpack.c.bf16 %v32_v1, %v31_v0  ;;  %v34_v5 = vld [vmem:[%s851_s1 + $0x18] sm:$0xff] }
   0x3   :  { %13 = vsyncpa [#allocation3], 0  ;;  %551 = vmatprep.subr.bf16.mxu1 %v634_v3  ;;  %472 = vmatprep.mubr.msk.f32.mxu1 %vm635_vm0, %v636_v6  ;;  %v549_v7 = vpack.c.bf16 %v34_v5, %v33_v2  ;;  %v30_v8 = vld [vmem:[%s850_s0] sm:$0xff]  ;;  %vm35_vm1 = vcmask 261120   ;;  %v111_v10 = vld [vmem:[%s852_s2 + $0x8] sm:$0xff]  ;;  %vm119_vm2 = vcmask 130048  }
   0x4   :  { %547 = vmatpush3.bf16.msra.mxu0 %v546_v4  ;;  %v110_v9 = vld [vmem:[%s852_s2] sm:$0xff]  ;;  %v195_v13 = vld [vmem:[%s854_s4 + $0x8] sm:$0xff]  ;;  %v196_v18 = vld [vmem:[%s854_s4 + $0x10] sm:$0xff]  ;;  %s639_s11 = smov [#allocation2]  }
   0x5   :  { %548 = vmatprep.subr.bf16.mxu0 %v634_v3  ;;  %v552_v11 = vpack.c.bf16 %v111_v10, %v110_v9  ;;  %v194_v12 = vld [vmem:[%s854_s4] sm:$0xff]  ;;  %v197_v19 = vld [vmem:[%s854_s4 + $0x18] sm:$0xff]  ;;  %v199_v22 = vld [vmem:[%s854_s4 + $0x28] sm:$0xff]  ;;  %s402_s12 = sshll.u32 %s639_s11, 4  ;;  %s403_s12 = int_to_ptr.vmem [resolvable:$true] %s402_s12 }
   0x6   :  { %v555_v15 = vpack.c.bf16 %v195_v13, %v194_v12  ;;  %v558_v20 = vpack.c.bf16 %v197_v19, %v196_v18  ;;  %v198_v21 = vld [vmem:[%s854_s4 + $0x20] sm:$0xff]  ;;  %v200_v24 = vld [vmem:[%s854_s4 + $0x30] sm:$0xff]  ;;  %v201_v25 = vld [vmem:[%s854_s4 + $0x38] sm:$0xff]  ;;  %p615_p1 = scmp.lt.s32.totalorder %s403_s12, %s403_s12 }
   0x7   :  { %553 = vmatpush3.bf16.msra.mxu1 %v552_v11  ;;  %v561_v23 = vpack.c.bf16 %v199_v22, %v198_v21  ;;  %v564_v26 = vpack.c.bf16 %v201_v25, %v200_v24  ;;  %v202_v27 = vld [vmem:[%s854_s4 + $0x40] sm:$0xff]  ;;  %v203_v28 = vld [vmem:[%s854_s4 + $0x48] sm:$0xff]  ;;  %v204_v30 = vld [vmem:[%s854_s4 + $0x50] sm:$0xff] }
   0x8   :  { %550 = vmatpush3.bf16.msra.mxu0 %v549_v7  ;;  %554 = vmatprep.subr.bf16.mxu1 %v634_v3  ;;  %v567_v29 = vpack.c.bf16 %v203_v28, %v202_v27  ;;  %v205_v31 = vld [vmem:[%s854_s4 + $0x58] sm:$0xff]  ;;  %v206_v33 = vld [vmem:[%s854_s4 + $0x60] sm:$0xff]  ;;  %v207_v34 = vld [vmem:[%s854_s4 + $0x68] sm:$0xff] }
   0x9   :  { %578 = vmatprep.subr.bf16.mxu0 %v634_v3  ;;  %v570_v32 = vpack.c.bf16 %v205_v31, %v204_v30  ;;  %v573_v35 = vpack.c.bf16 %v207_v34, %v206_v33  ;;  %v208_v36 = vld [vmem:[%s854_s4 + $0x70] sm:$0xff]  ;;  %v209_v37 = vld [vmem:[%s854_s4 + $0x78] sm:$0xff]  ;;  %v288_v39 = vld [vmem:[%s856_s6] sm:$0xff] }
   0xa   :  { %v576_v38 = vpack.c.bf16 %v209_v37, %v208_v36  ;;  %v289_v40 = vld [vmem:[%s856_s6 + $0x8] sm:$0xff]  ;;  %v290_v41 = vld [vmem:[%s856_s6 + $0x10] sm:$0xff]  ;;  %v291_v43 = vld [vmem:[%s856_s6 + $0x18] sm:$0xff] }
   0xb   :  { %466 = vmatmul.mubr.msk.f32.vlgmr.msra.gmra.mrb[0].mxu0 %vm35_vm1, %v30_v8  ;;  %v579_v42 = vpack.c.bf16 %v289_v40, %v288_v39  ;;  %v582_v44 = vpack.c.bf16 %v291_v43, %v290_v41  ;;  %v292_v45 = vld [vmem:[%s856_s6 + $0x20] sm:$0xff]  ;;  %v293_v46 = vld [vmem:[%s856_s6 + $0x28] sm:$0xff]  ;;  %v294_v48 = vld [vmem:[%s856_s6 + $0x30] sm:$0xff] }
   0xc   :  { %542 = vmatprep.mubr.msk.f32.mxu0 %vm635_vm0, %v636_v6  ;;  %v585_v47 = vpack.c.bf16 %v293_v46, %v292_v45  ;;  %v295_v49 = vld [vmem:[%s856_s6 + $0x38] sm:$0xff]  ;;  %v296_v51 = vld [vmem:[%s856_s6 + $0x40] sm:$0xff]  ;;  %v297_v52 = vld [vmem:[%s856_s6 + $0x48] sm:$0xff] }
   0xd   :  { %580 = vmatpush3.bf16.msra.mxu0 %v579_v42  ;;  %v588_v50 = vpack.c.bf16 %v295_v49, %v294_v48  ;;  %v591_v53 = vpack.c.bf16 %v297_v52, %v296_v51  ;;  %v298_v54 = vld [vmem:[%s856_s6 + $0x50] sm:$0xff]  ;;  %v299_v55 = vld [vmem:[%s856_s6 + $0x58] sm:$0xff]  ;;  %v300_v57 = vld [vmem:[%s856_s6 + $0x60] sm:$0xff] }
   0xe   :  { %581 = vmatprep.subr.bf16.mxu0 %v634_v3  ;;  %v594_v56 = vpack.c.bf16 %v299_v55, %v298_v54  ;;  %v301_v58 = vld [vmem:[%s856_s6 + $0x68] sm:$0xff]  ;;  %v411_v60 = vld [vmem:[%s853_s3] ss:$0 sm:$0xff]  ;;  %v302_v1 = vld [vmem:[%s856_s6 + $0x70] sm:$0xff] }
   0xf   :  { %v597_v59 = vpack.c.bf16 %v301_v58, %v300_v57  ;;  %v303_v2 = vld [vmem:[%s856_s6 + $0x78] sm:$0xff]  ;;  %v414_v9 = vld [vmem:[%s857_s7] ss:$0 sm:$0xff]  ;;  %s637_s6 = smov 112   ;;  %s610_s7 = scalar_lea.vmem %s403_s12, 128 }
  0x10   :  { %v600_v4 = vpack.c.bf16 %v303_v2, %v302_v1  ;;  %p611_p0 = scmp.ne.s32.totalorder %s403_s12, %s610_s7  ;;  %p616_p2 = scmp.lt.s32.totalorder %s610_s7, %s610_s7 }
  0x11   :  { %583 = vmatpush3.bf16.msra.mxu0 %v582_v44 }
  0x12   :  { %584 = vmatprep.subr.bf16.mxu0 %v634_v3  ;;  %p617_p3 = por %p616_p2, %p615_p1 }
  0x14   :  { %p618_p4 = pnand %p617_p3, %p611_p0 }
  0x15   :  { %586 = vmatpush3.bf16.msra.mxu0 %v585_v47 }
  0x16   :  { %587 = vmatprep.subr.bf16.mxu0 %v634_v3 }
  0x19   :  { %589 = vmatpush3.bf16.msra.mxu0 %v588_v50 }
  0x1a   :  { %590 = vmatprep.subr.bf16.mxu0 %v634_v3 }
  0x1d   :  { %592 = vmatpush3.bf16.msra.mxu0 %v591_v53 }
  0x1e   :  { %593 = vmatprep.subr.bf16.mxu0 %v634_v3 }
  0x21   :  { %595 = vmatpush3.bf16.msra.mxu0 %v594_v56 }
  0x22   :  { %596 = vmatprep.subr.bf16.mxu0 %v634_v3 }
  0x25   :  { %598 = vmatpush3.bf16.msra.mxu0 %v597_v59 }
  0x26   :  { %599 = vmatprep.subr.bf16.mxu0 %v634_v3 }
  0x29   :  { %601 = vmatpush3.bf16.msra.mxu0 %v600_v4 }
  0xde   :  { %v105_v14 = vpop.f32.mrb[0].mxu0 }
  0xdf   :  { %v109_v16 = vmul.f32 %v105_v14, %v105_v14  ;;  %v467_v17 = vpop.f32.mrb[1].mxu0 }
  0xe1   :  { %473 = vmatmul.mubr.msk.f32.vlgmr.msra.gmra.mrb[0].mxu1 %vm119_vm2, %v109_v16 }
  0xe2   :  { %556 = vmatpush3.bf16.msra.mxu1 %v555_v15  ;;  %507 = vmatprep.mubr.msk.f32.mxu1 %vm635_vm0, %v636_v6 }
  0xe3   :  { %557 = vmatprep.subr.bf16.mxu1 %v634_v3 }
  0xe6   :  { %559 = vmatpush3.bf16.msra.mxu1 %v558_v20 }
  0xe7   :  { %560 = vmatprep.subr.bf16.mxu1 %v634_v3 }
  0xea   :  { %562 = vmatpush3.bf16.msra.mxu1 %v561_v23 }
  0xeb   :  { %563 = vmatprep.subr.bf16.mxu1 %v634_v3 }
  0xee   :  { %565 = vmatpush3.bf16.msra.mxu1 %v564_v26 }
  0xef   :  { %566 = vmatprep.subr.bf16.mxu1 %v634_v3 }
  0xf2   :  { %568 = vmatpush3.bf16.msra.mxu1 %v567_v29 }
  0xf3   :  { %569 = vmatprep.subr.bf16.mxu1 %v634_v3 }
  0xf6   :  { %571 = vmatpush3.bf16.msra.mxu1 %v570_v32 }
  0xf7   :  { %572 = vmatprep.subr.bf16.mxu1 %v634_v3 }
  0xfa   :  { %574 = vmatpush3.bf16.msra.mxu1 %v573_v35 }
  0xfb   :  { %575 = vmatprep.subr.bf16.mxu1 %v634_v3  ;;  %v413_v3 = vld [vmem:[%s855_s5] ss:$0 sm:$0xff]  ;;  %s638_s5 = smov 16  }
  0xfe   :  { %577 = vmatpush3.bf16.msra.mxu1 %v576_v38 }
 0x1b4   :  { %v189_v61 = vpop.f32.mrb[0].mxu1 }
 0x1b5   :  { %v190_v62 = vadd.f32 %v411_v60, %v189_v61  ;;  %v474_v63 = vpop.f32.mrb[1].mxu1 }
 0x1b7   :  { %v193_v0 = vmax.f32 %v190_v62, 0.0 }
 0x1b9   :  { %508 = vmatmul.mubr.f32.vlgmr.msra.gmra.mrb[2].mxu1 %v193_v0 }
 0x28c   :  { %v283_v5 = vpop.f32.mrb[2].mxu1 }
 0x28d   :  { %v284_v6 = vadd.f32 %v413_v3, %v283_v5  ;;  %v509_v7 = vpop.f32.mrb[3].mxu1 }
 0x28f   :  { %v287_v8 = vmax.f32 %v284_v6, 0.0 }
 0x291   :  { %543 = vmatmul.mubr.f32.vlgmr.msra.gmra.mrb[2].mxu0 %v287_v8 }
 0x364   :  { %v377_v10 = vpop.f32.mrb[2].mxu0 }
 0x365   :  { %v378_v11 = vadd.f32 %v414_v9, %v377_v10  ;;  %v544_v12 = vpop.f32.mrb[3].mxu0 }
 0x367   :  { %v381_v13 = vmul.f32 %v378_v11, %v378_v11 }
 0x369   :  { %383 = vrot.lane.b32.xlu0 %v381_v13, %s637_s6 }
 0x3db   :  { %v384_v14 = vpop.permute.xlu0 %383 }
 0x3dc   :  { %v386_v15 = vadd.f32 %v384_v14, %v381_v13 }
 0x3de   :  { %608 = vrsqrt.f32 %v386_v15 }
 0x3e8   :  { %v609_v16 = vpop.eup %608 }
 0x3e9   :  { %v388_v17 = vmul.f32 0.25, %v609_v16 }
 0x3eb   :  { %390 = vrot.lane.b32.xlu0 %v388_v17, %s638_s5 }
 0x45d   :  { %v391_v18 = vpop.permute.xlu0 %390 }
 0x45e   :  { %v393_v19 = vsel %vm119_vm2, %v388_v17, %v391_v18 }
 0x45f   :  { %v394_v20 = vmul.f32 %v393_v19, %v378_v11 }
 0x461   :  { %395 = vst.msk [vmem:[#allocation2] sm:$0xff] %vm35_vm1, %v394_v20 }
 0x462   :  { %621 = shalt.err (!%p618_p4)
}
 0x463   :  { %s622_s1 = scalar_lea.hbm %s858_s8, 128 }
 0x464   :  { %p623_p5 = scmp.ne.s32.totalorder %s858_s8, %s622_s1  ;;  %p626_p6 = scmp.lt.u32.totalorder %s622_s1, %s858_s8 }
 0x466   :  { %p628_p7 = pnand %p626_p6, %p623_p5 }
 0x468   :  { %631 = shalt.err (!%p628_p7)
}
 0x469   :  { %405 = dma.vmem_to_hbm [thread:$0]  %s403_s12, 128, %s858_s8, [#allocation3]  }
 0x46a   :  { %632 = dma.done.wait [#allocation3], 128  }
 0x46b   :  { %633 = vsyncadd [#allocation3], 4294967168 }
 0x46c   :  { %409 = vsyncpa [#allocation3], 1 }

</bundles_post_ra>
